<compile_context>
chip_gen: v7x
topology: tpu7x:2x2x1
jax: 0.10.0
libtpu: 0.0.40
codegen_flags: <defaults>
</compile_context>

<pallas_src>
import functools

import jax
import jax.numpy as jnp
from jax.experimental import pallas as pl
from jax.experimental.pallas import tpu as pltpu

LANE = 128
VMEM_TILE_BUDGET = 40 * 1024 * 1024   # cap for tile sizing (safe on v7x's 64 MiB VMEM)
VMEM_LIMIT_BYTES = 48 * 1024 * 1024   # scoped VMEM request (below v7x physical)


def poly_kernel(xT_ref, p_ref, b2_ref, o_ref, *, total_b, mask_tail):
    # xT_ref: [V, bm]   p_ref: [M, V+2] = [ W1 | b1 | w2 ]   b2_ref: [1] (SMEM)
    # o_ref : [1, bm]
    x = xT_ref[...]                                   # [V, bm]
    n_vars, bm = x.shape

    if mask_tail:
        # Only the last grid step can be partial; lanes past B hold whatever the
        # bounded DMA left behind.  Force them to 1.0 so log() stays finite
        # (their outputs are masked on the partial store / sliced off anyway).
        lane = jax.lax.broadcasted_iota(jnp.int32, x.shape, 1)
        valid = pl.program_id(0) * bm + lane < total_b
        x = jnp.where(valid, x, 1.0)

    logx = jnp.log(x)                                 # [V, bm]  (EUP)

    p = p_ref[...]                                    # [M, V+2]
    w1 = p[:, :n_vars]                                # [M, V]
    b1 = p[:, n_vars:n_vars + 1]                      # [M, 1]
    w2 = p[:, n_vars + 1:n_vars + 2]                  # [M, 1]

    # z[m, b] = b1[m] + sum_v w1[m, v] * logx[v, b]
    # K=4 contraction -> unrolled broadcast FMAs on the VPU (deliberately off the MXU).
    acc = b1 + w1[:, 0:1] * logx[0:1, :]              # [M, bm]
    for v in range(1, n_vars):
        acc = acc + w1[:, v:v + 1] * logx[v:v + 1, :]

    e = jnp.exp(acc)                                  # [M, bm]  (EUP)

    # y[b] = b2 + sum_m w2[m] * e[m, b]  -> sublane reduce over M=8, lane-dense result.
    y = jnp.sum(e * w2, axis=0, keepdims=True)        # [1, bm]
    o_ref[...] = y + b2_ref[0]


def polynomial_nn_forward(x, w1, b1, w2, b2, *, bm=65536):
    """x: [B, V]; w1: [M, V]; b1: [M]; w2: [1, M]; b2: [1]  ->  [B, 1] float32."""
    B, V = x.shape
    M = w1.shape[0]

    # ---- batch-tile selection ----------------------------------------------
    n_lanes = pl.cdiv(B, LANE)                        # batch rounded up to 128-lane units
    half = pl.cdiv(n_lanes, 2) * LANE                 # ensure >=2 grid steps when possible (v7x: 2 TCs)
    # Rough per-lane VMEM bytes: double-buffered x^T + out blocks, plus f32
    # intermediates (logx [V,bm], acc/e/products ~4*[M,bm]).
    bytes_per_lane = 4 * (2 * V + 2 + V + 4 * M)
    bm_vmem = max(LANE, (VMEM_TILE_BUDGET // bytes_per_lane) // LANE * LANE)
    bm_user = max(LANE, (bm // LANE) * LANE)
    bm_eff = max(LANE, min(bm_user, bm_vmem, half))
    grid = pl.cdiv(B, bm_eff)
    mask_tail = (B % bm_eff) != 0

    # ---- inputs (no pad/concatenate: single fused transpose + f32 convert) --
    # TODO(synk): accept x already in [V, B] layout from the producer to drop this copy too.
    xT = jnp.transpose(x).astype(jnp.float32)         # [V, B], batch on the lane axis

    params = jnp.concatenate(
        [w1.astype(jnp.float32).reshape(M, V),
         b1.astype(jnp.float32).reshape(M, 1),
         w2.astype(jnp.float32).reshape(M, 1)],
        axis=1)                                       # [M, V+2] = [ W1 | b1 | w2 ]
    b2s = b2.astype(jnp.float32).reshape(1)           # SMEM scalar

    kernel = functools.partial(poly_kernel, total_b=B, mask_tail=mask_tail)

    out = pl.pallas_call(
        kernel,
        out_shape=jax.ShapeDtypeStruct((1, B), jnp.float32),
        grid_spec=pltpu.PrefetchScalarGridSpec(
            num_scalar_prefetch=0,
            grid=(grid,),
            in_specs=[
                pl.BlockSpec((V, bm_eff), lambda i: (0, i)),        # x^T tile, lane-dense
                pl.BlockSpec((M, V + 2), lambda i: (0, 0)),         # fused weights, resident
                pl.BlockSpec(memory_space=pltpu.MemorySpace.SMEM),  # b2 scalar
            ],
            out_specs=pl.BlockSpec((1, bm_eff), lambda i: (0, i)),  # lane-dense output
        ),
        compiler_params=pltpu.CompilerParams(
            dimension_semantics=("parallel",),        # batch grid shards across v7x's 2 TCs
            vmem_limit_bytes=VMEM_LIMIT_BYTES,
        ),
    )(xT, params, b2s)

    return out.reshape(B, 1)


if __name__ == "__main__":
    # Shapes consistent with the module: nrvariables=4, n_monomials=8.
    # B=300 (not a multiple of 128) exercises the in-kernel ragged-tail mask and
    # a 2-step parallel grid.
    B, V, M = 300, 4, 8

    key = jax.random.PRNGKey(0)
    kx, kw1, kb1, kw2, kb2 = jax.random.split(key, 5)

    # log(x) requires positive inputs (as the PyTorch model assumes).
    x = jax.random.uniform(kx, (B, V), dtype=jnp.float32, minval=0.5, maxval=2.0)

    # Parameter init mimicking nn.Linear's U(-1/sqrt(fan_in), 1/sqrt(fan_in)).
    bound1 = 1.0 / jnp.sqrt(jnp.float32(V))
    w1 = jax.random.uniform(kw1, (M, V), dtype=jnp.float32, minval=-bound1, maxval=bound1)
    b1 = jax.random.uniform(kb1, (M,), dtype=jnp.float32, minval=-bound1, maxval=bound1)
    bound2 = 1.0 / jnp.sqrt(jnp.float32(M))
    w2 = jax.random.uniform(kw2, (1, M), dtype=jnp.float32, minval=-bound2, maxval=bound2)
    b2 = jax.random.uniform(kb2, (1,), dtype=jnp.float32, minval=-bound2, maxval=bound2)

    out = polynomial_nn_forward(x, w1, b1, w2, b2)
    out = jax.block_until_ready(out)

    # Pure-JAX reference.
    ref = jnp.exp(jnp.log(x) @ w1.T + b1) @ w2.T + b2
    assert out.shape == (B, 1)
    assert jnp.allclose(out, ref, rtol=1e-5, atol=1e-5), "mismatch vs reference"

    print("KERNEL_OK")
</pallas_src>

<mosaic_0001>
module attributes {stable_mosaic.version = 11 : i64} {
  func.func @poly_kernel(%arg0: i32, %arg1: memref<4x256xf32, #tpu.memory_space<vmem>>, %arg2: memref<8x6xf32, #tpu.memory_space<vmem>>, %arg3: memref<1xf32, #tpu.memory_space<smem>>, %arg4: memref<1x256xf32, #tpu.memory_space<vmem>>) attributes {dimension_semantics = [#tpu.dimension_semantics<parallel>], iteration_bounds = array<i64: 2>, scalar_prefetch = 0 : i64, scratch_operands = 0 : i64, tpu.core_type = #tpu.core_type<tc>, window_params = [{transform_indices = @transform_0, window_bounds = array<i64: 4, 256>}, {pipeline_mode = #tpu.pipeline_mode<synchronous>, transform_indices = @transform_1, window_bounds = array<i64: 8, 6>}, {transform_indices = @transform_2, window_bounds = array<i64: 1>}, {transform_indices = @transform_3, window_bounds = array<i64: 1, 256>}]} {
    %c0 = arith.constant 0 : index
    %c0_0 = arith.constant 0 : index
    %0 = vector.load %arg1[%c0, %c0_0] : memref<4x256xf32, #tpu.memory_space<vmem>>, vector<4x256xf32>
    %1 = tpu.iota {dimensions = array<i32: 1>} : vector<4x256xi32>
    %c256_i32 = arith.constant 256 : i32
    %2 = arith.muli %arg0, %c256_i32 : i32
    %3 = vector.broadcast %2 : i32 to vector<4x256xi32>
    %4 = arith.addi %3, %1 : vector<4x256xi32>
    %c300_i32 = arith.constant 300 : i32
    %5 = vector.broadcast %c300_i32 : i32 to vector<4x256xi32>
    %6 = arith.cmpi slt, %4, %5 : vector<4x256xi32>
    %cst = arith.constant 1.000000e+00 : f32
    %7 = vector.broadcast %cst : f32 to vector<4x256xf32>
    %8 = arith.select %6, %0, %7 : vector<4x256xi1>, vector<4x256xf32>
    %9 = math.log %8 : vector<4x256xf32>
    %c0_1 = arith.constant 0 : index
    %c0_2 = arith.constant 0 : index
    %10 = vector.load %arg2[%c0_1, %c0_2] : memref<8x6xf32, #tpu.memory_space<vmem>>, vector<8x6xf32>
    %11 = vector.extract_strided_slice %10 {offsets = [0, 0], sizes = [8, 4], strides = [1, 1]} : vector<8x6xf32> to vector<8x4xf32>
    %12 = vector.extract_strided_slice %10 {offsets = [0, 4], sizes = [8, 1], strides = [1, 1]} : vector<8x6xf32> to vector<8x1xf32>
    %13 = vector.extract_strided_slice %10 {offsets = [0, 5], sizes = [8, 1], strides = [1, 1]} : vector<8x6xf32> to vector<8x1xf32>
    %14 = vector.extract_strided_slice %11 {offsets = [0, 0], sizes = [8, 1], strides = [1, 1]} : vector<8x4xf32> to vector<8x1xf32>
    %15 = vector.extract_strided_slice %9 {offsets = [0, 0], sizes = [1, 256], strides = [1, 1]} : vector<4x256xf32> to vector<1x256xf32>
    %16 = vector.broadcast %14 : vector<8x1xf32> to vector<8x256xf32>
    %17 = vector.broadcast %15 : vector<1x256xf32> to vector<8x256xf32>
    %18 = arith.mulf %16, %17 : vector<8x256xf32>
    %19 = vector.broadcast %12 : vector<8x1xf32> to vector<8x256xf32>
    %20 = arith.addf %19, %18 : vector<8x256xf32>
    %21 = vector.extract_strided_slice %11 {offsets = [0, 1], sizes = [8, 1], strides = [1, 1]} : vector<8x4xf32> to vector<8x1xf32>
    %22 = vector.extract_strided_slice %9 {offsets = [1, 0], sizes = [1, 256], strides = [1, 1]} : vector<4x256xf32> to vector<1x256xf32>
    %23 = vector.broadcast %21 : vector<8x1xf32> to vector<8x256xf32>
    %24 = vector.broadcast %22 : vector<1x256xf32> to vector<8x256xf32>
    %25 = arith.mulf %23, %24 : vector<8x256xf32>
    %26 = arith.addf %20, %25 : vector<8x256xf32>
    %27 = vector.extract_strided_slice %11 {offsets = [0, 2], sizes = [8, 1], strides = [1, 1]} : vector<8x4xf32> to vector<8x1xf32>
    %28 = vector.extract_strided_slice %9 {offsets = [2, 0], sizes = [1, 256], strides = [1, 1]} : vector<4x256xf32> to vector<1x256xf32>
    %29 = vector.broadcast %27 : vector<8x1xf32> to vector<8x256xf32>
    %30 = vector.broadcast %28 : vector<1x256xf32> to vector<8x256xf32>
    %31 = arith.mulf %29, %30 : vector<8x256xf32>
    %32 = arith.addf %26, %31 : vector<8x256xf32>
    %33 = vector.extract_strided_slice %11 {offsets = [0, 3], sizes = [8, 1], strides = [1, 1]} : vector<8x4xf32> to vector<8x1xf32>
    %34 = vector.extract_strided_slice %9 {offsets = [3, 0], sizes = [1, 256], strides = [1, 1]} : vector<4x256xf32> to vector<1x256xf32>
    %35 = vector.broadcast %33 : vector<8x1xf32> to vector<8x256xf32>
    %36 = vector.broadcast %34 : vector<1x256xf32> to vector<8x256xf32>
    %37 = arith.mulf %35, %36 : vector<8x256xf32>
    %38 = arith.addf %32, %37 : vector<8x256xf32>
    %39 = math.exp %38 : vector<8x256xf32>
    %40 = vector.broadcast %13 : vector<8x1xf32> to vector<8x256xf32>
    %41 = arith.mulf %39, %40 : vector<8x256xf32>
    %cst_3 = arith.constant dense<0.000000e+00> : vector<256xf32>
    %42 = vector.multi_reduction <add>, %41, %cst_3 [0] : vector<8x256xf32> to vector<256xf32>
    %43 = vector.shape_cast %42 : vector<256xf32> to vector<1x256xf32>
    %c0_4 = arith.constant 0 : index
    %44 = memref.load %arg3[%c0_4] : memref<1xf32, #tpu.memory_space<smem>>
    %45 = vector.broadcast %44 : f32 to vector<1x256xf32>
    %46 = arith.addf %43, %45 : vector<1x256xf32>
    %c0_5 = arith.constant 0 : index
    %c0_6 = arith.constant 0 : index
    %47 = vector.load %arg4[%c0_5, %c0_6] : memref<1x256xf32, #tpu.memory_space<vmem>>, vector<1x256xf32>
    tpu.vector_store %arg4[%c0_5, %c0_6], %46 {strides = array<i32>} : memref<1x256xf32, #tpu.memory_space<vmem>>, vector<1x256xf32>,
    return
  }
  func.func @transform_0(%arg0: i32) -> (i32, i32) {
    %c0_i32 = arith.constant 0 : i32
    %c0_i32_0 = arith.constant 0 : i32
    return %c0_i32, %arg0 : i32, i32
  }
  func.func @transform_1(%arg0: i32) -> (i32, i32) {
    %c0_i32 = arith.constant 0 : i32
    %c0_i32_0 = arith.constant 0 : i32
    %c0_i32_1 = arith.constant 0 : i32
    return %c0_i32, %c0_i32_0 : i32, i32
  }
  func.func @transform_2(%arg0: i32) -> i32 {
    %c0_i32 = arith.constant 0 : i32
    %c0_i32_0 = arith.constant 0 : i32
    return %c0_i32 : i32
  }
  func.func @transform_3(%arg0: i32) -> (i32, i32) {
    %c0_i32 = arith.constant 0 : i32
    %c0_i32_0 = arith.constant 0 : i32
    return %c0_i32, %arg0 : i32, i32
  }
}

</mosaic_0001>

<bundles_post_ra>
// kernel: tpu_custom_call.1
= control target key start
LH: loop header
LB: loop body
LE: loop exit
PB: predicated region body
PF: predicated region fallthrough
CT: control target
= control target key end

     0   :  { %s928_s0 = inlined_call_operand.hbm [shape: f32[4,300], index: 0, kind: input, shape index: {}]   ;;  %s929_s1 = inlined_call_operand.hbm [shape: f32[8,6], index: 1, kind: input, shape index: {}]   ;;  %s930_s2 = inlined_call_operand.<no memory space> [shape: f32[1], index: 2, kind: input, shape index: {}]   ;;  %s931_s3 = inlined_call_operand.hbm [shape: f32[1,300], index: 3, kind: output, shape index: {}]  }
   0x1   :  { %8 = sst [smem:[#allocation2]] %s930_s2 }
   0x2   :  { %9 = vsyncpa [#allocation4], 0 }
   0x3   :  { %11 = vsyncpa [#allocation4 + $0x1], 0 }
   0x4   :  { %12 = vsyncpa [#allocation7], 0 }
   0x5   :  { %13 = vsyncpa [#allocation5], 0 }
   0x6   :  { %15 = vsyncpa [#allocation5 + $0x1], 0  ;;  %s713_s14 = smov 0   ;;  %s715_s15 = smov 0  }
   0x7   :  { %s717_s16 = smov 0   ;;  %s719_s17 = smov 0  }
   0x8 LB: > { %s734_s2 = sadd.s32 4294967295, %s678_s17   ;;  %s455_s18 = sadd.s32 4294967294, %s678_s17   ;;  %s678_s17 = sphi %s719_s17, %s953_s17   ;;  %s674_s16 = sphi %s717_s16, %s952_s16   ;;  %s670_s15 = sphi %s715_s15, %s951_s15   ;;  %s666_s14 = sphi %s713_s14, %s950_s14  }
   0x9   : > { %s738_s19 = sadd.s32 1, %s678_s17   ;;  %s28_s20 = sadd.s32 1, %s674_s16 }
   0xa   : > { %s25_s21 = ssub.s32 %s678_s17, %s738_s19  ;;  %p35_p0 = scmp.ne.s32.totalorder %s674_s16, %s670_s15 }
   0xb   : > { %p26_p1 = scmp.eq.s32.totalorder %s25_s21, 0  ;;  %p36_p2 = scmp.eq.s32.totalorder %s678_s17, 0 }
   0xc   : > { %p41_p3 = scmp.ne.s32.totalorder %s670_s15, %s666_s14  ;;  %p932_p4 = scmp.eq.s32.totalorder %s734_s2, 0 }
   0xd   : > { %s750_s22 = scalar_select %p26_p1, %s674_s16, %s28_s20  }
   0xe   : > { %p752_p5 = por %p36_p2, %p35_p0  ;;  %p758_p6 = por %p932_p4, %p41_p3 }
   0xf   : > { %p107_p7 = scmp.eq.s32.totalorder %s734_s2, 1  ;;  %p113_p8 = scmp.eq.s32.totalorder %s455_s18, 1 }
  0x10   : > { %s936_s23 = scalar_select %p752_p5, 1, 0 }
  0x11   : > { %s937_s24 = scalar_select %p758_p6, 1, 0 }
  0x12   : > { %p456_p9 = scmp.ge.s32.totalorder %s678_s17, 1  ;;  %p120_p10 = scmp.lt.s32.totalorder %s678_s17, 3 }
  0x13   : > { %p765_p11 = por %p107_p7, %p35_p0  ;;  %p769_p12 = por %p113_p8, %p41_p3 }
  0x14   : > { %p773_p13 = pnand %p456_p9, %p120_p10  ;;  %s680_s28 = smov [#allocation6]  }
  0x15   : > { %s938_s25 = scalar_select %p765_p11, 1, 0 }
  0x16   : > { %s939_s26 = scalar_select %p769_p12, 1, 0 }
  0x17   : > { %s940_s27 = scalar_select %p773_p13, 1, 0 }
  0x18   : > { %p486_p1 = pneg %p773_p13  ;;  %s133_s29 = sshll.u32 %s680_s28, 4  ;;  %s134_s29 = int_to_ptr.vmem [resolvable:$true] %s133_s29 }
  0x19   : > { %s552_s6 = scalar_lea.hbm %s929_s1, 128 }
  0x1a   : > { %p781_p2 = pnand %p486_p1, %p932_p4  ;;  %p553_p0 = scmp.ne.s32.totalorder %s929_s1, %s552_s6 }
  0x1b   : > { %p559_p9 = scmp.lt.u32.totalorder %s552_s6, %s929_s1 }
  0x1c   : > { %p554_p3 = pneg %p781_p2 }
  0x1e   : > { %p555_p7 = pnand %p554_p3, %p553_p0 }
  0x20   : > { %p556_p8 = pneg %p555_p7 }
  0x22   : > { %p561_p10 = pnand %p559_p9, %p556_p8 }
  0x24   : > { %564 = shalt.err (!%p561_p10)
}
  0x25   : > { %s565_s11 = scalar_lea.vmem %s134_s29, 128  ;;  %p573_p11 = scmp.lt.s32.totalorder %s134_s29, %s134_s29 }
  0x26   : > { %p566_p1 = scmp.ne.s32.totalorder %s134_s29, %s565_s11  ;;  %p574_p6 = scmp.lt.s32.totalorder %s565_s11, %s565_s11 }
  0x28   : > { %p568_p4 = pnand %p566_p1, %p554_p3  ;;  %p575_p13 = por %p574_p6, %p573_p11 }
  0x2a   : > { %p569_p12 = pneg %p568_p4 }
  0x2c   : > { %p576_p5 = pnand %p575_p13, %p569_p12 }
  0x2e   : > { %579 = shalt.err (!%p576_p5)
}
  0x2f   : > { %489 = dma.hbm_to_vmem [thread:$0]  (!%p781_p2), %s929_s1, 128, %s134_s29, [#allocation7]  }
  0x30   : > { %p935_p0 = scmp.ge.s32.totalorder %s678_s17, 2 }
  0x31   : > { %p942_p7 = scmp.ne.s32.totalorder (!%p935_p0), %s936_s23, 0 }
  0x32   : > { %143 = sbr.rel (%p935_p0) target bundleno = 91 (0x5b), region = 24 }
  0x39   : > { %146 = sbr.rel (!%p942_p7) target bundleno = 91 (0x5b), region = 28  ;;  %s147_s18 = sand.u32 (%p942_p7), 1, %s674_s16  }
  0x3a   : > { %s460_s20 = sshll.u32 (%p942_p7), %s678_s17, 1  ;;  %s459_s21 = sshll.u32 (%p942_p7), %s147_s18, 3 }
  0x3b   : > { %s153_s28 = ssub.s32 (%p942_p7), 3, %s460_s20  ;;  %s811_s4 = scalar_lea.sflag (%p942_p7), [#allocation4], %s147_s18 }
  0x3c   : > { %p154_p4 = scmp.lt.s32.totalorder (%p942_p7), %s153_s28, 2  ;;  %s151_s5 = scalar_lea.vmem (%p942_p7), [#allocation3], %s459_s21 }
  0x40   : > { %s955_s28 = smov (!%p154_p4, %s153_s28), 2 }
  0x41   : > { %s808_s30 = sshll.u32 %s955_s28, 6 }
  0x42   : > { %s158_s29 = ssub.s32 128, %s808_s30 }
  0x43   : > { %159 = vsyncadd %s811_s4, %s158_s29  ;;  %p462_p5 = scmp.ne.s32.totalorder %s808_s30, 0  ;;  %s478_s23 = sshll.u32 %s678_s17, 7 }
  0x44   : > { %s819_s8 = scalar_lea.hbm %s928_s0, %s478_s23  ;;  %s165_s9 = sshll.u32 %s151_s5, 4  ;;  %s166_s9 = int_to_ptr.vmem [resolvable:$true] %s165_s9 }
  0x45   : > { %s580_s10 = scalar_lea.hbm %s819_s8, %s808_s30  ;;  %s584_s13 = scalar_lea.hbm %s928_s0, 192 }
  0x46   : > { %p581_p6 = scmp.ne.s32.totalorder %s819_s8, %s580_s10  ;;  %p585_p13 = scmp.lt.u32.totalorder %s819_s8, %s928_s0 }
  0x47   : > { %p586_p2 = scmp.lt.u32.totalorder %s584_s13, %s580_s10  ;;  %p588_p8 = scmp.lt.u32.totalorder %s580_s10, %s819_s8 }
  0x48   : > { %p582_p11 = pnand %p581_p6, %p462_p5 }
  0x49   : > { %p587_p3 = por %p586_p2, %p585_p13 }
  0x4a   : > { %p583_p12 = pneg %p582_p11 }
  0x4b   : > { %p589_p9 = por %p588_p8, %p587_p3 }
  0x4d   : > { %p590_p10 = pnand %p589_p9, %p583_p12 }
  0x4f   : > { %593 = shalt.err (!%p590_p10)
}
  0x50   : > { %s594_s21 = scalar_lea.vmem %s166_s9, %s808_s30  ;;  %s681_s28 = smov [#allocation3]  }
  0x51   : > { %p595_p1 = scmp.ne.s32.totalorder %s166_s9, %s594_s21  ;;  %s598_s29 = sshll.u32 %s681_s28, 4  ;;  %s599_s29 = int_to_ptr.vmem [resolvable:$false] %s598_s29 }
  0x52   : > { %s600_s5 = scalar_lea.vmem %s599_s29, 256  ;;  %p601_p6 = scmp.lt.s32.totalorder %s166_s9, %s599_s29 }
  0x53   : > { %p596_p7 = pnand %p595_p1, %p462_p5  ;;  %p602_p11 = scmp.lt.s32.totalorder %s600_s5, %s594_s21 }
  0x55   : > { %p597_p4 = pneg %p596_p7  ;;  %p603_p0 = por %p602_p11, %p601_p6 }
  0x57   : > { %p604_p2 = pnand %p603_p0, %p597_p4 }
  0x59   : > { %607 = shalt.err (!%p604_p2)
}
  0x5a   : > { %168 = dma.hbm_to_vmem [thread:$0]  (%p462_p5), %s819_s8, %s808_s30, %s166_s9, %s811_s4  }
  0x5b PF: > { %p943_p12 = scmp.ne.s32.totalorder %s940_s27, 0 }
  0x5c   : > { %s845_s23 = sand.u32 (!%p943_p12), 1, %s670_s15   ;;  %p944_p0 = scmp.ne.s32.totalorder (!%p943_p12), %s937_s24, 0 }
  0x5d   : > { %174 = sbr.rel (%p943_p12) target bundleno = 312 (0x138), region = 32  ;;  %s467_s6 = sshll.u32 (!%p943_p12), %s845_s23, 3 }
  0x5e   : > { %s177_s7 = scalar_lea.sflag (!%p943_p12), [#allocation4], %s845_s23  ;;  %s849_s10 = scalar_lea.vmem (!%p943_p12), [#allocation3], %s467_s6 }
  0x64   : > { %653 = dma.done.wait (%p944_p0), %s177_s7, 128  }
  0x65   : > { %655 = vsyncadd (%p944_p0), %s177_s7, 4294967168  ;;  %p945_p5 = scmp.eq.s32.totalorder %s734_s2, 0 }
  0x67   : > { %657 = dma.done.wait (%p945_p5), [#allocation7], 128   ;;  %p946_p13 = pmov %p945_p5 }
  0x68   : > { %v682_v0 = vmov 1   ;;  %v683_v1 = vmov 0   ;;  %v236_v2 = vld [vmem:[#allocation6] sm:$0xff]  ;;  %v684_v3 = vmov 2   ;;  %v685_v4 = vmov 4   ;;  %s470_s24 = sshll.u32 %s734_s2, 8 }
  0x69   : > { %659 = vsyncadd (%p946_p13), [#allocation7], 4294967168  ;;  %539 = vset.pattern.permute.xlu1 %v682_v0  ;;  %537 = vset.pattern.permute.xlu0 %v683_v1  ;;  %v686_v5 = vmov 3   ;;  %v687_v6 = vmov 5   ;;  %v218_v7 = vlaneseq  ;;  %v222_v10 = vstv %s470_s24  ;;  %v217_v13 = vld [vmem:[%s849_s10] sm:$0xff]  ;;  %s328_s27 = sld [smem:[#allocation2]] }
  0x6a   : > { %259 = vperm.xlu1 %539, %v236_v2   ;;  %239 = vperm.xlu0 %537, %v236_v2   ;;  %v228_v14 = vcombine.high %v217_v13, %v217_v13  ;;  %s469_s30 = sshll.u32 %s845_s23, 1  ;;  %s356_s8 = scalar_lea.sflag [#allocation5], %s845_s23 }
  0x6b   : > { %v219_v8 = vand.u32 127, %v218_v7  ;;  %v863_v18 = vshrl.u32 %v218_v7, 7  ;;  %vm352_vm2 = vcmp.lt.s32.totalorder %v218_v7, 256  ;;  %s206_s4 = scalar_lea.vmem [#allocation8], %s469_s30  ;;  %p947_p3 = scmp.ne.s32.totalorder %s938_s25, 0 }
  0x6c   : > { %s472_s9 = sshll.u32 (%p947_p3), %s734_s2, 1 }
  0x6d   : > { %v220_v9 = vadd.s32 128, %v219_v8  ;;  %v223_v11 = vadd.s32 %v222_v10, %v219_v8  ;;  %v244_v22 = vsub.s32 0, %v863_v18  ;;  %v264_v23 = vsub.s32 1, %v863_v18  ;;  %s364_s11 = ssub.s32 (%p947_p3), 3, %s472_s9 }
  0x6e   : > { %540 = vset.pattern.permute.xlu1 %v684_v3  ;;  %538 = vset.pattern.permute.xlu0 %v685_v4  ;;  %v280_v28 = vsub.s32 2, %v863_v18  ;;  %v296_v31 = vsub.s32 3, %v863_v18  ;;  %v688_v3 = vmov 1966171168   ;;  %p365_p8 = scmp.lt.s32.totalorder (%p947_p3), %s364_s11, 2 }
  0x6f   : > { %275 = vperm.xlu1 %540, %v236_v2   ;;  %253 = vperm.xlu0 %538, %v236_v2   ;;  %v224_v12 = vadd.s32 %v222_v10, %v220_v9  ;;  %vm225_vm0 = vcmp.lt.s32.totalorder %v223_v11, 300  ;;  %v336_v4 = vunpack.c.l.s4 %v688_v3  ;;  %v329_v10 = vstv %s328_s27 }
  0x70   : > { %v230_v15 = vsel %vm225_vm0, %v217_v13, 1.0 }
  0x71   : > { %vm226_vm1 = vcmp.lt.s32.totalorder %v224_v12, 300  ;;  %544 = vlog2.f32 %v230_v15  ;;  %v337_v11 = vunpack.c.0.s8 %v336_v4 }
  0x72   : > { %v231_v16 = vsel %vm226_vm1, %v228_v14, 1.0 }
  0x73   : > { %541 = vset.pattern.permute.xlu1 %v686_v5  ;;  %542 = vset.pattern.permute.xlu0 %v687_v6  ;;  %546 = vlog2.f32 %v231_v16  ;;  %v340_v16 = vsub.s32 %v337_v11, %v863_v18 }
  0x74   : > { %291 = vperm.xlu1 %541, %v236_v2   ;;  %311 = vperm.xlu0 %542, %v236_v2  }
  0x7b   : > { %v545_v17 = vpop.eup %544 }
  0x7c   : > { %v233_v20 = vmul.f32 0.6931472, %v545_v17 }
  0x7d   : > { %v547_v19 = vpop.eup %546 }
  0x7e   : > { %v235_v21 = vmul.f32 0.6931472, %v547_v19  ;;  %v245_v26 = vrot.slane %v233_v20, %v244_v22  ;;  %v265_v29 = vrot.slane %v233_v20, %v264_v23  ;;  %v281_v34 = vrot.slane %v233_v20, %v280_v28 }
  0x7f   : > { %v297_v42 = vrot.slane %v233_v20, %v296_v31 }
  0x80   : > { %v249_v27 = vrot.slane %v235_v21, %v244_v22  ;;  %v269_v30 = vrot.slane %v235_v21, %v264_v23  ;;  %v285_v35 = vrot.slane %v235_v21, %v280_v28  ;;  %v301_v43 = vrot.slane %v235_v21, %v296_v31 }
  0xe9   : > { %v260_v24 = vpop.permute.xlu1 %259  ;;  %v240_v25 = vpop.permute.xlu0 %239 }
  0xea   : > { %v250_v32 = vmul.f32 %v245_v26, %v240_v25  ;;  %v251_v33 = vmul.f32 %v249_v27, %v240_v25  ;;  %v270_v38 = vmul.f32 %v265_v29, %v260_v24  ;;  %v271_v39 = vmul.f32 %v269_v30, %v260_v24 }
  0xee   : > { %v276_v36 = vpop.permute.xlu1 %275  ;;  %v254_v37 = vpop.permute.xlu0 %253 }
  0xef   : > { %v256_v40 = vadd.f32 %v254_v37, %v250_v32  ;;  %v257_v41 = vadd.f32 %v254_v37, %v251_v33  ;;  %v286_v44 = vmul.f32 %v281_v34, %v276_v36  ;;  %v287_v45 = vmul.f32 %v285_v35, %v276_v36 }
  0xf1   : > { %v272_v46 = vadd.f32 %v270_v38, %v256_v40  ;;  %v273_v47 = vadd.f32 %v271_v39, %v257_v41 }
  0xf3   : > { %v292_v48 = vpop.permute.xlu1 %291  ;;  %v288_v49 = vadd.f32 %v286_v44, %v272_v46  ;;  %v289_v50 = vadd.f32 %v287_v45, %v273_v47  ;;  %v312_v57 = vpop.permute.xlu0 %311 }
  0xf4   : > { %v302_v51 = vmul.f32 %v297_v42, %v292_v48  ;;  %v303_v52 = vmul.f32 %v301_v43, %v292_v48 }
  0xf6   : > { %v304_v53 = vadd.f32 %v302_v51, %v288_v49  ;;  %v305_v54 = vadd.f32 %v303_v52, %v289_v50 }
  0xf8   : > { %v306_v55 = vmul.f32 1.442695, %v304_v53  ;;  %v308_v56 = vmul.f32 1.442695, %v305_v54 }
  0xfa   : > { %548 = vpow2.f32 %v306_v55 }
  0xfb   : > { %550 = vpow2.f32 %v308_v56 }
 0x104   : > { %v549_v58 = vpop.eup %548 }
 0x105   : > { %v551_v59 = vpop.eup %550  ;;  %v314_v60 = vmul.f32 %v549_v58, %v312_v57 }
 0x106   : > { %v315_v61 = vmul.f32 %v551_v59, %v312_v57 }
 0x107   : > { %v316_v62 = vrot.slane %v314_v60, 4 }
 0x108   : > { %v322_v63 = vrot.slane %v315_v61, 4 }
 0x109   : > { %v317_v0 = vadd.f32 %v316_v62, %v314_v60 }
 0x10a   : > { %v323_v1 = vadd.f32 %v322_v63, %v315_v61 }
 0x10b   : > { %v318_v2 = vrot.slane %v317_v0, 2 }
 0x10c   : > { %v324_v5 = vrot.slane %v323_v1, 2 }
 0x10d   : > { %v319_v6 = vadd.f32 %v318_v2, %v317_v0 }
 0x10e   : > { %v325_v8 = vadd.f32 %v324_v5, %v323_v1 }
 0x10f   : > { %v320_v9 = vrot.slane %v319_v6, 1 }
 0x110   : > { %v326_v12 = vrot.slane %v325_v8, 1 }
 0x111   : > { %v321_v13 = vadd.f32 %v320_v9, %v319_v6 }
 0x112   : > { %v327_v14 = vadd.f32 %v326_v12, %v325_v8 }
 0x113   : > { %v330_v15 = vadd.f32 %v329_v10, %v321_v13 }
 0x114   : > { %v331_v17 = vadd.f32 %v329_v10, %v327_v14 }
 0x116   : > { %v334_v19 = vcombine.low %v330_v15, %v331_v17  ;;  %362 = sbr.rel (!%p947_p3) target bundleno = 312 (0x138), region = 44 }
 0x118   : > { %v341_v20 = vrot.slane %v334_v19, %v340_v16 }
 0x11a   : > { %v348_v21 = vrot.slane %v341_v20, %v340_v16 }
 0x11c   : > { %354 = vst.msk [vmem:[%s206_s4] sm:$0x3] %vm352_vm2, %v348_v21 }
 0x11d   : > { %s957_s11 = smov (!%p365_p8, %s364_s11), 2 }
 0x11e   : > { %s876_s12 = sshll.u32 %s957_s11, 4 }
 0x11f   : > { %s369_s13 = ssub.s32 32, %s876_s12 }
 0x120   : > { %370 = vsyncadd %s356_s8, %s369_s13  ;;  %p474_p9 = scmp.ne.s32.totalorder %s876_s12, 0  ;;  %s479_s18 = sshll.u32 %s734_s2, 5 }
 0x121   : > { %s886_s21 = scalar_lea.hbm %s931_s3, %s479_s18  ;;  %s375_s28 = sshll.u32 %s206_s4, 4  ;;  %s376_s28 = int_to_ptr.vmem [resolvable:$true] %s375_s28 }
 0x122   : > { %s608_s29 = scalar_lea.vmem %s376_s28, %s876_s12  ;;  %s689_s5 = smov [#allocation8]  }
 0x123   : > { %p609_p10 = scmp.ne.s32.totalorder %s376_s28, %s608_s29  ;;  %s612_s6 = sshll.u32 %s689_s5, 4  ;;  %s613_s6 = int_to_ptr.vmem [resolvable:$false] %s612_s6 }
 0x124   : > { %s614_s7 = scalar_lea.vmem %s613_s6, 64  ;;  %p615_p4 = scmp.lt.s32.totalorder %s376_s28, %s613_s6 }
 0x125   : > { %p610_p1 = pnand %p609_p10, %p474_p9  ;;  %p616_p6 = scmp.lt.s32.totalorder %s614_s7, %s608_s29 }
 0x127   : > { %p611_p7 = pneg %p610_p1  ;;  %p617_p11 = por %p616_p6, %p615_p4 }
 0x129   : > { %p618_p2 = pnand %p617_p11, %p611_p7 }
 0x12b   : > { %621 = shalt.err (!%p618_p2)
}
 0x12c   : > { %s622_s2 = scalar_lea.hbm %s886_s21, %s876_s12  ;;  %s626_s27 = scalar_lea.hbm %s931_s3, 48 }
 0x12d   : > { %p623_p12 = scmp.ne.s32.totalorder %s886_s21, %s622_s2  ;;  %p627_p13 = scmp.lt.u32.totalorder %s886_s21, %s931_s3 }
 0x12e   : > { %p628_p3 = scmp.lt.u32.totalorder %s626_s27, %s622_s2  ;;  %p630_p10 = scmp.lt.u32.totalorder %s622_s2, %s886_s21 }
 0x12f   : > { %p624_p0 = pnand %p623_p12, %p474_p9 }
 0x130   : > { %p629_p8 = por %p628_p3, %p627_p13 }
 0x131   : > { %p625_p5 = pneg %p624_p0 }
 0x132   : > { %p631_p1 = por %p630_p10, %p629_p8 }
 0x134   : > { %p632_p7 = pnand %p631_p1, %p625_p5 }
 0x136   : > { %635 = shalt.err (!%p632_p7)
}
 0x137   : > { %378 = dma.vmem_to_hbm [thread:$0]  (%p474_p9), %s376_s28, %s876_s12, %s886_s21, %s356_s8  }
 0x138 PF: > { %s387_s9 = sand.u32 1, %s666_s14   ;;  %p948_p4 = scmp.ne.s32.totalorder %s939_s26, 0 }
 0x139   : > { %p949_p6 = scmp.ge.s32.totalorder %s678_s17, 2  ;;  %s388_s11 = scalar_lea.sflag [#allocation5], %s387_s9 }
 0x13b   : > { %p491_p11 = pnand %p949_p6, %p948_p4 }
 0x13d   : > { %661 = dma.done.wait (!%p491_p11), %s388_s11, 32  }
 0x13e   : > { %663 = vsyncadd (!%p491_p11), %s388_s11, 4294967264  ;;  %p18_p2 = scmp.ge.s32.totalorder %s738_s19, 4   ;;  %s950_s14 = smov %s670_s15 }
 0x13f   : > { %s951_s15 = smov %s674_s16  ;;  %s952_s16 = smov %s750_s22 }
 0x140   : > { %s953_s17 = smov %s738_s19  ;;  %20 = sbr.rel (!%p18_p2) target bundleno = 8 (0x8), region = 81 }
 0x147   :  { %393 = vsyncpa [#allocation4], 1 }
 0x148   :  { %395 = vsyncpa [#allocation4 + $0x1], 1 }
 0x149   :  { %396 = vsyncpa [#allocation7], 1 }
 0x14a   :  { %397 = vsyncpa [#allocation5], 1 }
 0x14b   :  { %399 = vsyncpa [#allocation5 + $0x1], 1 }

</bundles_post_ra>
